<compile_context>
chip_gen: v7x
topology: tpu7x:2x2x1
jax: 0.10.0
libtpu: 0.0.40
codegen_flags: <defaults>
</compile_context>

<pallas_src>
import functools

import jax
import jax.numpy as jnp
from jax.experimental import pallas as pl
from jax.experimental.pallas import tpu as pltpu


def instance_norm_wrapper_kernel(x_ref, w_ref, b_ref, o_ref, *, hw):
    # x_ref: (rows, HWp) block, rows = nb*C, HWp >= hw (zero padded).
    x = x_ref[...].astype(jnp.float32)                       # (rows, HWp)

    # One-pass per-(batch, channel) statistics over the spatial (lane) axis.
    # Zero padding adds 0 to both sums, so the real-hw divisor is exact.
    s1 = jnp.sum(x, axis=-1, keepdims=True)                   # (rows, 1)
    s2 = jnp.sum(x * x, axis=-1, keepdims=True)               # (rows, 1)
    mean = s1 * (1.0 / hw)
    denom = max(hw - 1, 1)                                    # torch.std is unbiased
    var = jnp.maximum((s2 - mean * mean * hw) * (1.0 / denom), 0.0)
    std = jnp.sqrt(var)                                       # (rows, 1)

    # Tiny (rows, 1) reciprocal instead of a (rows, HWp)-wide divide.
    inv_std = pl.reciprocal(std + 1e-9, approx=False)

    # Normalize + clamp over the whole block in one vectorized pass.
    norm = jnp.clip((x - mean) * inv_std, -6.0, 6.0)          # (rows, HWp)

    # 1x1 conv for all nb batch elements as ONE matmul against the resident
    # block-diagonal weight kron(I_nb, W).
    w = w_ref[...]                                            # (rows, rows)
    y = jnp.dot(w, norm.astype(w.dtype), preferred_element_type=jnp.float32)

    # De-normalize with the *input* statistics (exact wrapper semantics).
    o_ref[...] = ((y + b_ref[...]) * std + mean).astype(o_ref.dtype)


def _pick_nb(n, c, hwp, budget_bytes, cap_rows):
    """Largest divisor of n whose (nb*c, hwp) f32 block fits budget & row cap,
    with nb*c a multiple of 8 (or covering the full array) for legal tiling."""
    candidates = [d for d in range(1, n + 1)
                  if n % d == 0 and ((d * c) % 8 == 0 or d == n)]
    fitting = [d for d in candidates
               if d * c * hwp * 4 <= budget_bytes and d * c <= cap_rows]
    return max(fitting) if fitting else min(candidates)


def instance_norm_wrapper(x_nchw, weight, bias, *, batch_budget_bytes=4 << 20):
    """x_nchw: (N, C, H, W); weight: (C, C) 1x1-conv weight; bias: (C,)."""
    n, c, h, w_ = x_nchw.shape
    hw = h * w_
    hwp = ((hw + 127) // 128) * 128                           # lane-dense last dim

    x2d = x_nchw.reshape(n * c, hw)
    if hwp != hw:
        x2d = jnp.pad(x2d, ((0, 0), (0, hwp - hw)))

    # Rows per grid step: keep the block-diag matmul overhead well under the
    # HBM roofline (memory-bound regime) while amortizing per-step overhead.
    cap_rows = max(256, c)
    nb = _pick_nb(n, c, hwp, batch_budget_bytes, cap_rows)
    rows = nb * c

    # bf16 MXU operands only pay off once the 1x1 conv is genuinely large.
    use_bf16 = c >= 128
    wbd = jnp.kron(jnp.eye(nb, dtype=weight.dtype), weight)   # (rows, rows)
    if use_bf16:
        wbd = wbd.astype(jnp.bfloat16)
    b_tiled = jnp.tile(bias.reshape(c, 1), (nb, 1))           # (rows, 1)

    kernel = functools.partial(instance_norm_wrapper_kernel, hw=hw)

    # Scoped VMEM: double-buffered in/out blocks + resident weight + f32 temps.
    block_bytes = rows * hwp * 4
    wbd_bytes = rows * rows * wbd.dtype.itemsize
    vmem_limit = 8 * block_bytes + 2 * wbd_bytes + (2 << 20)
    vmem_limit = int(min(max(vmem_limit, 32 << 20), 100 << 20))
    # TODO(synk): for very large C*H*W (where even nb=1 exceeds v7x's 64 MiB
    # VMEM), add a two-pass HW-tiled variant (stats kernel -> norm/conv/denorm).

    out = pl.pallas_call(
        kernel,
        out_shape=jax.ShapeDtypeStruct((n * c, hwp), x_nchw.dtype),
        grid=(n // nb,),
        in_specs=[
            pl.BlockSpec((rows, hwp), lambda i: (i, 0)),
            pl.BlockSpec((rows, rows), lambda i: (0, 0)),      # resident weight
            pl.BlockSpec((rows, 1), lambda i: (0, 0)),         # resident bias
        ],
        out_specs=pl.BlockSpec((rows, hwp), lambda i: (i, 0)),
        compiler_params=pltpu.CompilerParams(
            dimension_semantics=("parallel",),
            vmem_limit_bytes=vmem_limit,
        ),
    )(x2d, wbd, b_tiled)

    return out[:, :hw].reshape(n, c, h, w_)


def reference(x, weight, bias):
    """Plain-JAX reference matching the PyTorch wrapper (inner model = 1x1 conv)."""
    mean = x.mean(axis=(-1, -2), keepdims=True)
    std = x.std(axis=(-1, -2), keepdims=True, ddof=1)          # unbiased, like torch.std
    nrm = jnp.clip((x - mean) / (std + 1e-9), -6.0, 6.0)
    y = jnp.einsum("oc,nchw->nohw", weight, nrm) + bias.reshape(1, -1, 1, 1)
    return y * std + mean


if __name__ == "__main__":
    key = jax.random.PRNGKey(0)
    kx, kw, kb = jax.random.split(key, 3)

    N, C, H, W = 2, 4, 16, 16
    x = jax.random.normal(kx, (N, C, H, W), dtype=jnp.float32)
    # deterministic synthetic inner-model parameters (1x1 conv: C -> C)
    weight = jax.random.normal(kw, (C, C), dtype=jnp.float32) * 0.1
    bias = jax.random.normal(kb, (C,), dtype=jnp.float32) * 0.1

    out = instance_norm_wrapper(x, weight, bias)
    out = jax.block_until_ready(out)

    ref = reference(x, weight, bias)
    assert out.shape == (N, C, H, W)
    assert jnp.allclose(out, ref, atol=1e-4, rtol=1e-4), "mismatch vs reference"

    print("KERNEL_OK")
</pallas_src>

<mosaic_0001>
module attributes {stable_mosaic.version = 11 : i64} {
  func.func @instance_norm_wrapper_kernel(%arg0: i32, %arg1: memref<8x256xf32, #tpu.memory_space<vmem>>, %arg2: memref<8x8xf32, #tpu.memory_space<vmem>>, %arg3: memref<8x1xf32, #tpu.memory_space<vmem>>, %arg4: memref<8x256xf32, #tpu.memory_space<vmem>>) attributes {dimension_semantics = [#tpu.dimension_semantics<parallel>], iteration_bounds = array<i64: 1>, scalar_prefetch = 0 : i64, scratch_operands = 0 : i64, tpu.core_type = #tpu.core_type<tc>, window_params = [{transform_indices = @transform_0, window_bounds = array<i64: 8, 256>}, {pipeline_mode = #tpu.pipeline_mode<synchronous>, transform_indices = @transform_1, window_bounds = array<i64: 8, 8>}, {pipeline_mode = #tpu.pipeline_mode<synchronous>, transform_indices = @transform_2, window_bounds = array<i64: 8, 1>}, {transform_indices = @transform_3, window_bounds = array<i64: 8, 256>}]} {
    %c0 = arith.constant 0 : index
    %c0_0 = arith.constant 0 : index
    %0 = vector.load %arg1[%c0, %c0_0] : memref<8x256xf32, #tpu.memory_space<vmem>>, vector<8x256xf32>
    %cst = arith.constant dense<0.000000e+00> : vector<8xf32>
    %1 = vector.multi_reduction <add>, %0, %cst [1] : vector<8x256xf32> to vector<8xf32>
    %2 = vector.shape_cast %1 : vector<8xf32> to vector<8x1xf32>
    %3 = arith.mulf %0, %0 : vector<8x256xf32>
    %cst_1 = arith.constant dense<0.000000e+00> : vector<8xf32>
    %4 = vector.multi_reduction <add>, %3, %cst_1 [1] : vector<8x256xf32> to vector<8xf32>
    %5 = vector.shape_cast %4 : vector<8xf32> to vector<8x1xf32>
    %cst_2 = arith.constant 3.906250e-03 : f32
    %6 = vector.broadcast %cst_2 : f32 to vector<8x1xf32>
    %7 = arith.mulf %2, %6 : vector<8x1xf32>
    %8 = arith.mulf %7, %7 : vector<8x1xf32>
    %cst_3 = arith.constant 2.560000e+02 : f32
    %9 = vector.broadcast %cst_3 : f32 to vector<8x1xf32>
    %10 = arith.mulf %8, %9 : vector<8x1xf32>
    %11 = arith.subf %5, %10 : vector<8x1xf32>
    %cst_4 = arith.constant 0.00392156886 : f32
    %12 = vector.broadcast %cst_4 : f32 to vector<8x1xf32>
    %13 = arith.mulf %11, %12 : vector<8x1xf32>
    %cst_5 = arith.constant 0.000000e+00 : f32
    %14 = vector.broadcast %cst_5 : f32 to vector<8x1xf32>
    %15 = arith.maximumf %13, %14 : vector<8x1xf32>
    %16 = math.sqrt %15 : vector<8x1xf32>
    %cst_6 = arith.constant 9.99999971E-10 : f32
    %17 = vector.broadcast %cst_6 : f32 to vector<8x1xf32>
    %18 = arith.addf %16, %17 : vector<8x1xf32>
    %19 = tpu.reciprocal %18 : vector<8x1xf32> -> vector<8x1xf32>
    %20 = vector.broadcast %7 : vector<8x1xf32> to vector<8x256xf32>
    %21 = arith.subf %0, %20 : vector<8x256xf32>
    %22 = vector.broadcast %19 : vector<8x1xf32> to vector<8x256xf32>
    %23 = arith.mulf %21, %22 : vector<8x256xf32>
    %cst_7 = arith.constant -6.000000e+00 : f32
    %cst_8 = arith.constant 6.000000e+00 : f32
    %24 = vector.broadcast %cst_7 : f32 to vector<8x256xf32>
    %25 = arith.maximumf %24, %23 : vector<8x256xf32>
    %26 = vector.broadcast %cst_8 : f32 to vector<8x256xf32>
    %27 = arith.minimumf %26, %25 : vector<8x256xf32>
    %c0_9 = arith.constant 0 : index
    %c0_10 = arith.constant 0 : index
    %28 = vector.load %arg2[%c0_9, %c0_10] : memref<8x8xf32, #tpu.memory_space<vmem>>, vector<8x8xf32>
    %cst_11 = arith.constant dense<0.000000e+00> : vector<8x256xf32>
    %29 = tpu.matmul %28, %27, %cst_11 {dimension_numbers = #tpu.dot_dimension_numbers<[1], [0], [0], [1], [0, 0, 1, 1], [], []>} : vector<8x8xf32>, vector<8x256xf32>, vector<8x256xf32> -> vector<8x256xf32>
    %c0_12 = arith.constant 0 : index
    %c0_13 = arith.constant 0 : index
    %30 = vector.load %arg3[%c0_12, %c0_13] : memref<8x1xf32, #tpu.memory_space<vmem>>, vector<8x1xf32>
    %31 = vector.broadcast %30 : vector<8x1xf32> to vector<8x256xf32>
    %32 = arith.addf %29, %31 : vector<8x256xf32>
    %33 = vector.broadcast %16 : vector<8x1xf32> to vector<8x256xf32>
    %34 = arith.mulf %32, %33 : vector<8x256xf32>
    %35 = vector.broadcast %7 : vector<8x1xf32> to vector<8x256xf32>
    %36 = arith.addf %34, %35 : vector<8x256xf32>
    %c0_14 = arith.constant 0 : index
    %c0_15 = arith.constant 0 : index
    %37 = vector.load %arg4[%c0_14, %c0_15] : memref<8x256xf32, #tpu.memory_space<vmem>>, vector<8x256xf32>
    tpu.vector_store %arg4[%c0_14, %c0_15], %36 {strides = array<i32>} : memref<8x256xf32, #tpu.memory_space<vmem>>, vector<8x256xf32>,
    return
  }
  func.func @transform_0(%arg0: i32) -> (i32, i32) {
    %c0_i32 = arith.constant 0 : i32
    %c0_i32_0 = arith.constant 0 : i32
    return %arg0, %c0_i32 : i32, i32
  }
  func.func @transform_1(%arg0: i32) -> (i32, i32) {
    %c0_i32 = arith.constant 0 : i32
    %c0_i32_0 = arith.constant 0 : i32
    %c0_i32_1 = arith.constant 0 : i32
    return %c0_i32, %c0_i32_0 : i32, i32
  }
  func.func @transform_2(%arg0: i32) -> (i32, i32) {
    %c0_i32 = arith.constant 0 : i32
    %c0_i32_0 = arith.constant 0 : i32
    %c0_i32_1 = arith.constant 0 : i32
    return %c0_i32, %c0_i32_0 : i32, i32
  }
  func.func @transform_3(%arg0: i32) -> (i32, i32) {
    %c0_i32 = arith.constant 0 : i32
    %c0_i32_0 = arith.constant 0 : i32
    return %arg0, %c0_i32 : i32, i32
  }
}

</mosaic_0001>

<bundles_post_ra>
// kernel: tpu_custom_call.1
= control target key start
LH: loop header
LB: loop body
LE: loop exit
PB: predicated region body
PF: predicated region fallthrough
CT: control target
= control target key end

     0   :  { %8 = vsyncpa [#allocation3], 0  ;;  %s278_s0 = inlined_call_operand.hbm [shape: f32[8,256], index: 0, kind: input, shape index: {}]   ;;  %s279_s1 = inlined_call_operand.vmem [shape: f32[8,8], index: 1, kind: input, shape index: {}]   ;;  %s280_s2 = inlined_call_operand.vmem [shape: f32[8,1], index: 2, kind: input, shape index: {}]   ;;  %s281_s3 = inlined_call_operand.hbm [shape: f32[8,256], index: 3, kind: output, shape index: {}]  }
   0x1   :  { %9 = vsyncpa [#allocation4], 0  ;;  %s224_s12 = smov [#allocation2]   ;;  %s176_s16 = scalar_lea.hbm %s278_s0, 256 }
   0x2   :  { %s16_s13 = sshll.u32 %s224_s12, 4  ;;  %p177_p0 = scmp.ne.s32.totalorder %s278_s0, %s176_s16  ;;  %s17_s13 = int_to_ptr.vmem [resolvable:$true] %s16_s13 }
   0x3   :  { %p180_p1 = scmp.lt.u32.totalorder %s176_s16, %s278_s0 }
   0x5   :  { %p182_p2 = pnand %p180_p1, %p177_p0 }
   0x7   :  { %185 = shalt.err (!%p182_p2)
}
   0x8   :  { %s186_s21 = scalar_lea.vmem %s17_s13, 256  ;;  %p191_p4 = scmp.lt.s32.totalorder %s17_s13, %s17_s13 }
   0x9   :  { %p187_p3 = scmp.ne.s32.totalorder %s17_s13, %s186_s21  ;;  %p192_p5 = scmp.lt.s32.totalorder %s186_s21, %s186_s21 }
   0xb   :  { %p193_p6 = por %p192_p5, %p191_p4 }
   0xd   :  { %p194_p7 = pnand %p193_p6, %p187_p3 }
   0xf   :  { %197 = shalt.err (!%p194_p7)
}
  0x10   :  { %19 = dma.hbm_to_vmem [thread:$0]  %s278_s0, 256, %s17_s13, [#allocation3]  }
  0x11   :  { %220 = dma.done.wait [#allocation3], 256  }
  0x12   :  { %221 = vsyncadd [#allocation3], 4294967040  ;;  %v27_v0 = vld [vmem:[#allocation2] sm:$0xff]  ;;  %v28_v1 = vld [vmem:[#allocation2 + $0x8] sm:$0xff]  ;;  %v225_v6 = vmov 0.0   ;;  %v226_v8 = vmov 0  }
  0x13   :  { %v29_v2 = vadd.f32 %v28_v1, %v27_v0  ;;  %v32_v3 = vmul.f32 %v27_v0, %v27_v0  ;;  %v33_v4 = vmul.f32 %v28_v1, %v28_v1  ;;  %135 = vmatprep.mubr.f32.mxu0 %v225_v6  ;;  %v61_v7 = vld [vmem:[%s280_s2] sm:$0xff]  ;;  %170 = vset.pattern.permute.xlu1 %v226_v8  ;;  %vm67_vm2 = vcmask 64512   ;;  %s227_s26 = smov [#allocation5]  }
  0x14   :  { %171 = vset.pattern.permute.xlu0 %v226_v8  ;;  %64 = vperm.xlu1 %170, %v61_v7   ;;  %v60_v30 = vld [vmem:[%s279_s1] sm:$0xff]  ;;  %s154_s27 = sshll.u32 %s227_s26, 4  ;;  %s155_s27 = int_to_ptr.vmem [resolvable:$true] %s154_s27 }
  0x15   :  { %30 = vadd.xlane.f32.xlu0 %v29_v2  ;;  %v34_v5 = vadd.f32 %v33_v4, %v32_v3  ;;  %s198_s28 = scalar_lea.vmem %s155_s27, 256  ;;  %p203_p9 = scmp.lt.s32.totalorder %s155_s27, %s155_s27 }
  0x16   :  { %p199_p8 = scmp.ne.s32.totalorder %s155_s27, %s198_s28  ;;  %p204_p10 = scmp.lt.s32.totalorder %s198_s28, %s198_s28 }
  0x18   :  { %p205_p11 = por %p204_p10, %p203_p9 }
  0x19   :  { %35 = vadd.xlane.f32.xlu0 %v34_v5 }
  0x1a   :  { %p206_p12 = pnand %p205_p11, %p199_p8 }
  0x93   :  { %v65_v31 = vpop.permute.xlu1 %64 }
  0xa2   :  { %v31_v9 = vpop.xlane.xlu0 %30 }
  0xa3   :  { %v37_v10 = vmul.f32 0.00390625, %v31_v9 }
  0xa5   :  { %v38_v11 = vmul.f32 %v37_v10, %v37_v10  ;;  %v53_v23 = vsub.f32 %v28_v1, %v37_v10  ;;  %v52_v24 = vsub.f32 %v27_v0, %v37_v10 }
  0xa6   :  { %v36_v12 = vpop.xlane.xlu0 %35 }
  0xa7   :  { %v39_v13 = vmul.f32 256.0, %v38_v11 }
  0xa9   :  { %v40_v14 = vsub.f32 %v36_v12, %v39_v13 }
  0xab   :  { %v41_v15 = vmul.f32 0.003921569, %v40_v14 }
  0xad   :  { %v42_v16 = vmax.f32 %v41_v15, 0.0 }
  0xaf   :  { %172 = vrsqrt.f32 %v42_v16  ;;  %vm45_vm0 = vcmp.eq.f32.partialorder %v42_v16, inf  ;;  %v48_v19 = vand.u32 2147483648, %v42_v16  ;;  %vm47_vm1 = vcmp.eq.f32.partialorder %v42_v16, 0.0 }
  0xb9   :  { %v173_v17 = vpop.eup %172 }
  0xba   :  { %v44_v18 = vmul.f32 %v173_v17, %v42_v16 }
  0xbc   :  { %v46_v20 = vsel %vm45_vm0, %v42_v16, %v44_v18 }
  0xbd   :  { %v49_v21 = vsel %vm47_vm1, %v48_v19, %v46_v20 }
  0xbe   :  { %v50_v22 = vadd.f32 1e-09, %v49_v21 }
  0xc0   :  { %174 = vrcp.f32 %v50_v22 }
  0xca   :  { %v175_v25 = vpop.eup %174 }
  0xcb   :  { %v55_v26 = vmul.f32 %v175_v25, %v53_v23  ;;  %v54_v27 = vmul.f32 %v175_v25, %v52_v24 }
  0xcd   :  { %v164_v28 = vclamps-f32 %v55_v26, 6.0  ;;  %v163_v29 = vclamps-f32 %v54_v27, 6.0 }
  0xcf   :  { %71 = vmatprep.subr.mxu0 %v164_v28 }
  0xd0   :  { %72 = vmatpush1.msra.mxu0 %v163_v29 }
  0xd1   :  { %165 = vmatmul.mubr.msk.f32.vlgmr.msra.gmra.mrb[0].mxu0 %vm67_vm2, %v60_v30 }
 0x1a4   :  { %v137_v32 = vpop.f32.mrb[0].mxu0 }
 0x1a5   :  { %v138_v33 = vadd.f32 %v137_v32, %v65_v31  ;;  %v139_v34 = vpop.f32.mrb[1].mxu0 }
 0x1a6   :  { %v140_v35 = vadd.f32 %v139_v34, %v65_v31 }
 0x1a7   :  { %v142_v36 = vmul.f32 %v138_v33, %v49_v21 }
 0x1a8   :  { %v143_v37 = vmul.f32 %v140_v35, %v49_v21 }
 0x1a9   :  { %v144_v38 = vadd.f32 %v142_v36, %v37_v10 }
 0x1aa   :  { %v145_v39 = vadd.f32 %v143_v37, %v37_v10 }
 0x1ab   :  { %146 = vst [vmem:[#allocation5] sm:$0xff] %v144_v38 }
 0x1ac   :  { %147 = vst [vmem:[#allocation5 + $0x8] sm:$0xff] %v145_v39 }
 0x1ad   :  { %209 = shalt.err (!%p206_p12)
}
 0x1ae   :  { %s210_s30 = scalar_lea.hbm %s281_s3, 256 }
 0x1af   :  { %p211_p13 = scmp.ne.s32.totalorder %s281_s3, %s210_s30  ;;  %p214_p0 = scmp.lt.u32.totalorder %s210_s30, %s281_s3 }
 0x1b1   :  { %p216_p1 = pnand %p214_p0, %p211_p13 }
 0x1b3   :  { %219 = shalt.err (!%p216_p1)
}
 0x1b4   :  { %157 = dma.vmem_to_hbm [thread:$0]  %s155_s27, 256, %s281_s3, [#allocation4]  }
 0x1b5   :  { %222 = dma.done.wait [#allocation4], 256  }
 0x1b6   :  { %223 = vsyncadd [#allocation4], 4294967040 }
 0x1b7   :  { %161 = vsyncpa [#allocation3], 1 }
 0x1b8   :  { %162 = vsyncpa [#allocation4], 1 }

</bundles_post_ra>
